<compile_context>
chip_gen: v6e
topology: v6e:2x2x1
jax: 0.10.0
libtpu: 0.0.40
codegen_flags: <defaults>
</compile_context>

<pallas_src>
import functools

import jax
import jax.numpy as jnp
from jax.experimental import pallas as pl
from jax.experimental.pallas import tpu as pltpu


def _round_up(x, m):
    return ((x + m - 1) // m) * m


def _vmem_caps():
    """(vmem_limit_bytes, tile_budget_bytes), generation aware with a safe fallback."""
    cap = None
    try:
        cap = getattr(pltpu.get_tpu_info(), "vmem_capacity_bytes", None)
    except Exception:
        cap = None
    if cap is None:
        cap = 64 * 1024 * 1024            # conservative: assume v7x-sized VMEM
    if cap <= 64 * 1024 * 1024:           # v7x: 64 MiB per TensorCore
        limit = 48 * 1024 * 1024
    else:                                 # v5e / v6e: 128 MiB
        limit = 96 * 1024 * 1024
    budget = limit - 8 * 1024 * 1024      # headroom for compiler scratch / semaphores
    return limit, budget


def _pick_tiles(n, abytes, slab_width, acc_width, f_out_pad, out_bytes, wt_bytes, budget):
    """Pick (tile_n, tile_k, n_adj_buffers) from an explicit VMEM footprint formula."""
    if n < 128:
        # Full-extent blocks: no (8,128) constraint, single grid point per axis.
        return n, n, 2

    # Row tile: as big as possible while keeping >=2 row tiles (v7x has 2 TensorCores).
    tile_n = 128
    for cand in (512, 256):
        if cand * 2 <= n:
            tile_n = cand
            break

    # Tile-independent resident bytes.
    fixed = (2 * f_out_pad * 4                      # bias (double-buffered, tiny)
             + wt_bytes                             # resident bf16 W^T (fused path only)
             + tile_n * acc_width * 4               # f32 accumulator scratch
             + 2 * tile_n * f_out_pad * out_bytes)  # output double-buffer

    kmax = (n // 128) * 128                         # keep block <= array extent
    tile_k = 128
    for cand in (2048, 1024, 512, 256, 128):
        if cand > kmax:
            continue
        need = fixed + 2 * tile_n * cand * abytes + 2 * cand * slab_width * 2
        if need <= budget:
            tile_k = cand
            break

    # Third adjacency buffer if it is the only per-step stream and there is headroom.
    nbuf_a = 2
    steps_k = -(-n // tile_k)
    need3 = fixed + 3 * tile_n * tile_k * abytes + 2 * tile_k * slab_width * 2
    if steps_k >= 3 and need3 <= budget:
        nbuf_a = 3
    return tile_n, tile_k, nbuf_a


def _adj_blockspec(tile_n, tile_k, nbuf):
    idx = lambda i, k: (i, k)
    if nbuf > 2:
        try:
            return pl.BlockSpec((tile_n, tile_k), idx, pipeline_mode=pl.Buffered(nbuf))
        except TypeError:       # pipeline_mode not supported -> default double buffering
            pass
    return pl.BlockSpec((tile_n, tile_k), idx)


def _masked_adj_tile(adj_ref, k, tile_k, n_valid, ragged_k):
    """Adjacency tile at its native dtype, ragged K columns zeroed, cast to bf16."""
    a = adj_ref[...]
    if ragged_k:
        col = jax.lax.broadcasted_iota(jnp.int32, a.shape, 1) + k * tile_k
        a = jnp.where(col < n_valid, a, jnp.zeros_like(a))
    return a.astype(jnp.bfloat16)


def _gc_agg_linear_kernel(adj_ref, x_ref, wt_ref, b_ref, o_ref, acc_ref, *,
                          n_valid, tile_k, ragged_k):
    # adj_ref: (tn, tk) native dtype, x_ref: (tk, F_in_p) bf16, wt_ref: (F_in_p, F_out_p)
    # bf16, b_ref: (1, F_out_p) f32, o_ref: (tn, F_out_p), acc_ref: (tn, F_in_p) f32.
    k = pl.program_id(1)

    @pl.when(k == 0)
    def _():
        acc_ref[...] = jnp.zeros_like(acc_ref)

    a = _masked_adj_tile(adj_ref, k, tile_k, n_valid, ragged_k)
    acc_ref[...] += jnp.dot(a, x_ref[...], preferred_element_type=jnp.float32)

    @pl.when(k == pl.num_programs(1) - 1)
    def _():
        out = jnp.dot(acc_ref[...].astype(jnp.bfloat16), wt_ref[...],
                      preferred_element_type=jnp.float32) + b_ref[...]
        o_ref[...] = out.astype(o_ref.dtype)


def _gc_agg_bias_kernel(adj_ref, y_ref, b_ref, o_ref, acc_ref, *,
                        n_valid, tile_k, ragged_k):
    # Y = X @ W^T precomputed in the wrapper (used when F_out_pad < F_in_pad).
    # adj_ref: (tn, tk) native dtype, y_ref: (tk, F_out_p) bf16, acc_ref: (tn, F_out_p) f32.
    k = pl.program_id(1)

    @pl.when(k == 0)
    def _():
        acc_ref[...] = jnp.zeros_like(acc_ref)

    a = _masked_adj_tile(adj_ref, k, tile_k, n_valid, ragged_k)
    acc_ref[...] += jnp.dot(a, y_ref[...], preferred_element_type=jnp.float32)

    @pl.when(k == pl.num_programs(1) - 1)
    def _():
        o_ref[...] = (acc_ref[...] + b_ref[...]).astype(o_ref.dtype)


@jax.jit
def graph_conv(adj, features, weight, bias):
    """DGL GraphConv forward: (A @ X) @ W^T + b.

    adj:      [N, N]      adj[i, j] = 1.0 iff edge j -> i (destination-row convention)
    features: [N, F_in]
    weight:   [F_out, F_in]  (nn.Linear weight)
    bias:     [F_out]
    returns   [N, F_out] in features.dtype
    """
    n, f_in = features.shape
    f_out = weight.shape[0]
    out_dtype = features.dtype

    f_in_p = _round_up(f_in, 128)      # lane-dense X / acc on the fused path
    f_out_pad = _round_up(f_out, 128)  # lane-dense output stores (no vst.msk)
    fused = f_in_p <= f_out_pad        # aggregate along the narrower padded width

    abytes = jnp.dtype(adj.dtype).itemsize
    out_bytes = jnp.dtype(out_dtype).itemsize
    slab_w = f_in_p if fused else f_out_pad
    acc_w = f_in_p if fused else f_out_pad
    wt_bytes = 2 * f_in_p * f_out_pad * 2 if fused else 0   # bf16 W^T, double-buffered

    vmem_limit, budget = _vmem_caps()
    tile_n, tile_k, nbuf_a = _pick_tiles(n, abytes, slab_w, acc_w, f_out_pad,
                                         out_bytes, wt_bytes, budget)
    grid_m = pl.cdiv(n, tile_n)
    grid_k = pl.cdiv(n, tile_k)
    n_pad_k = grid_k * tile_k
    ragged_k = (n % tile_k) != 0

    bias_p = jnp.zeros((1, f_out_pad), jnp.float32).at[0, :f_out].set(
        bias.astype(jnp.float32))

    a_spec = _adj_blockspec(tile_n, tile_k, nbuf_a)
    cparams = pltpu.CompilerParams(
        dimension_semantics=("parallel", "arbitrary"),
        vmem_limit_bytes=int(vmem_limit),
    )

    if fused:
        # Aggregate with the (padded) narrower F_in, apply the Linear in the epilogue.
        x_p = jnp.zeros((n_pad_k, f_in_p), jnp.bfloat16).at[:n, :f_in].set(
            features.astype(jnp.bfloat16))
        wt_p = jnp.zeros((f_in_p, f_out_pad), jnp.bfloat16).at[:f_in, :f_out].set(
            weight.T.astype(jnp.bfloat16))
        kernel = functools.partial(_gc_agg_linear_kernel, n_valid=n, tile_k=tile_k,
                                   ragged_k=ragged_k)
        out_p = pl.pallas_call(
            kernel,
            out_shape=jax.ShapeDtypeStruct((n, f_out_pad), out_dtype),
            grid_spec=pltpu.PrefetchScalarGridSpec(
                num_scalar_prefetch=0,
                grid=(grid_m, grid_k),
                in_specs=[
                    a_spec,                                                   # A tile
                    pl.BlockSpec((tile_k, f_in_p), lambda i, k: (k, 0)),      # X K-slab
                    pl.BlockSpec((f_in_p, f_out_pad), lambda i, k: (0, 0)),   # W^T (bf16)
                    pl.BlockSpec((1, f_out_pad), lambda i, k: (0, 0)),        # bias
                ],
                out_specs=pl.BlockSpec((tile_n, f_out_pad), lambda i, k: (i, 0)),
                scratch_shapes=[pltpu.VMEM((tile_n, f_in_p), jnp.float32)],
            ),
            compiler_params=cparams,
        )(adj, x_p, wt_p, bias_p)
    else:
        # F_out_pad < F_in_pad: cheaper to aggregate the projected features, A @ (X W^T).
        y = jnp.dot(features.astype(jnp.bfloat16), weight.T.astype(jnp.bfloat16),
                    preferred_element_type=jnp.float32)
        y_p = jnp.zeros((n_pad_k, f_out_pad), jnp.bfloat16).at[:n, :f_out].set(
            y.astype(jnp.bfloat16))
        kernel = functools.partial(_gc_agg_bias_kernel, n_valid=n, tile_k=tile_k,
                                   ragged_k=ragged_k)
        out_p = pl.pallas_call(
            kernel,
            out_shape=jax.ShapeDtypeStruct((n, f_out_pad), out_dtype),
            grid_spec=pltpu.PrefetchScalarGridSpec(
                num_scalar_prefetch=0,
                grid=(grid_m, grid_k),
                in_specs=[
                    a_spec,                                                   # A tile
                    pl.BlockSpec((tile_k, f_out_pad), lambda i, k: (k, 0)),   # XW^T K-slab
                    pl.BlockSpec((1, f_out_pad), lambda i, k: (0, 0)),        # bias
                ],
                out_specs=pl.BlockSpec((tile_n, f_out_pad), lambda i, k: (i, 0)),
                scratch_shapes=[pltpu.VMEM((tile_n, f_out_pad), jnp.float32)],
            ),
            compiler_params=cparams,
        )(adj, y_p, bias_p)

    return out_p[:, :f_out]


def graph_conv_ref(adj, features, weight, bias):
    """Reference mirroring the kernel's bf16 roundings (f32 accumulation throughout)."""
    f_in = features.shape[1]
    f_out = weight.shape[0]
    hp = jax.lax.Precision.HIGHEST
    a = adj.astype(jnp.float32)          # 0/1 adjacency: the in-kernel bf16 cast is exact
    if _round_up(f_in, 128) <= _round_up(f_out, 128):
        x = features.astype(jnp.bfloat16).astype(jnp.float32)
        h = jnp.dot(a, x, precision=hp)
        h = h.astype(jnp.bfloat16).astype(jnp.float32)           # epilogue input rounding
        wt = weight.T.astype(jnp.bfloat16).astype(jnp.float32)
        return jnp.dot(h, wt, precision=hp) + bias[None, :].astype(jnp.float32)
    y = jnp.dot(features.astype(jnp.bfloat16), weight.T.astype(jnp.bfloat16),
                preferred_element_type=jnp.float32)
    y = y.astype(jnp.bfloat16).astype(jnp.float32)
    return jnp.dot(a, y, precision=hp) + bias[None, :].astype(jnp.float32)


def _make_case(key, n, f_in, f_out, p_edge=0.05):
    k_adj, k_x, k_w, k_b = jax.random.split(key, 4)
    adj = (jax.random.uniform(k_adj, (n, n)) < p_edge).astype(jnp.float32)
    features = jax.random.normal(k_x, (n, f_in), dtype=jnp.float32)
    bound = 1.0 / (f_in ** 0.5)
    weight = jax.random.uniform(k_w, (f_out, f_in), minval=-bound, maxval=bound,
                                dtype=jnp.float32)
    bias = jax.random.uniform(k_b, (f_out,), minval=-bound, maxval=bound,
                              dtype=jnp.float32)
    return adj, features, weight, bias


def _check(out, ref, shape):
    assert out.shape == shape, (out.shape, shape)
    # bf16 rounding of the intermediate A@X can differ by 1 ulp between the tiled kernel
    # and the reference (different f32 accumulation order), hence the 1e-2 tolerance.
    assert jnp.allclose(out, ref, atol=1e-2, rtol=1e-2), \
        float(jnp.max(jnp.abs(out - ref)))


if __name__ == "__main__":
    key = jax.random.PRNGKey(0)
    k1, k2, k3 = jax.random.split(key, 3)

    # Case 1: fused-Linear epilogue path (F_in padded to 128), 3 row tiles,
    # ragged K axis (384 % 256 != 0) exercising the in-kernel adjacency mask.
    adj, features, weight, bias = _make_case(k1, n=384, f_in=32, f_out=64)
    out = jax.block_until_ready(graph_conv(adj, features, weight, bias))
    _check(out, graph_conv_ref(adj, features, weight, bias), (384, 64))

    # Case 2: pre-projection path (F_out_pad < F_in_pad), N not a multiple of 128
    # -> ragged M and K tiles, adjacency streamed unpadded.
    adj2, features2, weight2, bias2 = _make_case(k2, n=200, f_in=200, f_out=40)
    out2 = jax.block_until_ready(graph_conv(adj2, features2, weight2, bias2))
    _check(out2, graph_conv_ref(adj2, features2, weight2, bias2), (200, 40))

    # Case 3: larger square case -> big (512, 1024) tiles from the VMEM-budget picker,
    # two parallel row tiles (both v7x TensorCores busy), single K step.
    adj3, features3, weight3, bias3 = _make_case(k3, n=1024, f_in=256, f_out=256)
    out3 = jax.block_until_ready(graph_conv(adj3, features3, weight3, bias3))
    _check(out3, graph_conv_ref(adj3, features3, weight3, bias3), (1024, 256))

    print("KERNEL_OK")
</pallas_src>

<mosaic_0001>
module attributes {stable_mosaic.version = 11 : i64} {
  func.func @_gc_agg_linear_kernel(%arg0: i32, %arg1: i32, %arg2: memref<128x256xf32, #tpu.memory_space<vmem>>, %arg3: memref<256x128xbf16, #tpu.memory_space<vmem>>, %arg4: memref<128x128xbf16, #tpu.memory_space<vmem>>, %arg5: memref<1x128xf32, #tpu.memory_space<vmem>>, %arg6: memref<128x128xf32, #tpu.memory_space<vmem>>, %arg7: memref<128x128xf32, #tpu.memory_space<vmem>>) attributes {dimension_semantics = [#tpu.dimension_semantics<parallel>, #tpu.dimension_semantics<arbitrary>], iteration_bounds = array<i64: 3, 2>, scalar_prefetch = 0 : i64, scratch_operands = 1 : i64, tpu.core_type = #tpu.core_type<tc>, window_params = [{transform_indices = @transform_0, window_bounds = array<i64: 128, 256>}, {transform_indices = @transform_1, window_bounds = array<i64: 256, 128>}, {pipeline_mode = #tpu.pipeline_mode<synchronous>, transform_indices = @transform_2, window_bounds = array<i64: 128, 128>}, {pipeline_mode = #tpu.pipeline_mode<synchronous>, transform_indices = @transform_3, window_bounds = array<i64: 1, 128>}, {transform_indices = @transform_4, window_bounds = array<i64: 128, 128>}]} {
    %c0_i32 = arith.constant 0 : i32
    %0 = arith.cmpi eq, %arg1, %c0_i32 : i32
    %1 = arith.extui %0 : i1 to i32
    %c0_i32_0 = arith.constant 0 : i32
    %2 = arith.cmpi ne, %1, %c0_i32_0 : i32
    scf.if %2 {
      %cst_10 = arith.constant 0.000000e+00 : f32
      %21 = vector.broadcast %cst_10 : f32 to vector<128x128xf32>
      %c0_11 = arith.constant 0 : index
      %c0_12 = arith.constant 0 : index
      %22 = vector.load %arg7[%c0_11, %c0_12] : memref<128x128xf32, #tpu.memory_space<vmem>>, vector<128x128xf32>
      tpu.vector_store %arg7[%c0_11, %c0_12], %21 {strides = array<i32>} : memref<128x128xf32, #tpu.memory_space<vmem>>, vector<128x128xf32>,
    } else {
    }
    %c0 = arith.constant 0 : index
    %c0_1 = arith.constant 0 : index
    %3 = vector.load %arg2[%c0, %c0_1] : memref<128x256xf32, #tpu.memory_space<vmem>>, vector<128x256xf32>
    %4 = tpu.iota {dimensions = array<i32: 1>} : vector<128x256xi32>
    %c256_i32 = arith.constant 256 : i32
    %5 = arith.muli %arg1, %c256_i32 : i32
    %6 = vector.broadcast %5 : i32 to vector<128x256xi32>
    %7 = arith.addi %4, %6 : vector<128x256xi32>
    %c384_i32 = arith.constant 384 : i32
    %8 = vector.broadcast %c384_i32 : i32 to vector<128x256xi32>
    %9 = arith.cmpi slt, %7, %8 : vector<128x256xi32>
    %cst = arith.constant 0.000000e+00 : f32
    %10 = vector.broadcast %cst : f32 to vector<128x256xf32>
    %11 = arith.select %9, %3, %10 : vector<128x256xi1>, vector<128x256xf32>
    %12 = arith.truncf %11 : vector<128x256xf32> to vector<128x256xbf16>
    %c0_2 = arith.constant 0 : index
    %c0_3 = arith.constant 0 : index
    %13 = vector.load %arg7[%c0_2, %c0_3] : memref<128x128xf32, #tpu.memory_space<vmem>>, vector<128x128xf32>
    %c0_4 = arith.constant 0 : index
    %c0_5 = arith.constant 0 : index
    %14 = vector.load %arg3[%c0_4, %c0_5] : memref<256x128xbf16, #tpu.memory_space<vmem>>, vector<256x128xbf16>
    %cst_6 = arith.constant dense<0.000000e+00> : vector<128x128xf32>
    %15 = tpu.matmul %12, %14, %cst_6 {dimension_numbers = #tpu.dot_dimension_numbers<[1], [0], [0], [1], [0, 0, 1, 1], [], []>} : vector<128x256xbf16>, vector<256x128xbf16>, vector<128x128xf32> -> vector<128x128xf32>
    %16 = arith.addf %13, %15 : vector<128x128xf32>
    %c0_7 = arith.constant 0 : index
    %c0_8 = arith.constant 0 : index
    %17 = vector.load %arg7[%c0_7, %c0_8] : memref<128x128xf32, #tpu.memory_space<vmem>>, vector<128x128xf32>
    tpu.vector_store %arg7[%c0_7, %c0_8], %16 {strides = array<i32>} : memref<128x128xf32, #tpu.memory_space<vmem>>, vector<128x128xf32>,
    %c1_i32 = arith.constant 1 : i32
    %18 = arith.cmpi eq, %arg1, %c1_i32 : i32
    %19 = arith.extui %18 : i1 to i32
    %c0_i32_9 = arith.constant 0 : i32
    %20 = arith.cmpi ne, %19, %c0_i32_9 : i32
    scf.if %20 {
      %c0_10 = arith.constant 0 : index
      %c0_11 = arith.constant 0 : index
      %21 = vector.load %arg7[%c0_10, %c0_11] : memref<128x128xf32, #tpu.memory_space<vmem>>, vector<128x128xf32>
      %22 = arith.truncf %21 : vector<128x128xf32> to vector<128x128xbf16>
      %c0_12 = arith.constant 0 : index
      %c0_13 = arith.constant 0 : index
      %23 = vector.load %arg4[%c0_12, %c0_13] : memref<128x128xbf16, #tpu.memory_space<vmem>>, vector<128x128xbf16>
      %cst_14 = arith.constant dense<0.000000e+00> : vector<128x128xf32>
      %24 = tpu.matmul %22, %23, %cst_14 {dimension_numbers = #tpu.dot_dimension_numbers<[1], [0], [0], [1], [0, 0, 1, 1], [], []>} : vector<128x128xbf16>, vector<128x128xbf16>, vector<128x128xf32> -> vector<128x128xf32>
      %c0_15 = arith.constant 0 : index
      %c0_16 = arith.constant 0 : index
      %25 = vector.load %arg5[%c0_15, %c0_16] : memref<1x128xf32, #tpu.memory_space<vmem>>, vector<1x128xf32>
      %26 = vector.broadcast %25 : vector<1x128xf32> to vector<128x128xf32>
      %27 = arith.addf %24, %26 : vector<128x128xf32>
      %c0_17 = arith.constant 0 : index
      %c0_18 = arith.constant 0 : index
      %28 = vector.load %arg6[%c0_17, %c0_18] : memref<128x128xf32, #tpu.memory_space<vmem>>, vector<128x128xf32>
      tpu.vector_store %arg6[%c0_17, %c0_18], %27 {strides = array<i32>} : memref<128x128xf32, #tpu.memory_space<vmem>>, vector<128x128xf32>,
    } else {
    }
    return
  }
  func.func @transform_0(%arg0: i32, %arg1: i32) -> (i32, i32) {
    %c0_i32 = arith.constant 0 : i32
    return %arg0, %arg1 : i32, i32
  }
  func.func @transform_1(%arg0: i32, %arg1: i32) -> (i32, i32) {
    %c0_i32 = arith.constant 0 : i32
    %c0_i32_0 = arith.constant 0 : i32
    return %arg1, %c0_i32 : i32, i32
  }
  func.func @transform_2(%arg0: i32, %arg1: i32) -> (i32, i32) {
    %c0_i32 = arith.constant 0 : i32
    %c0_i32_0 = arith.constant 0 : i32
    %c0_i32_1 = arith.constant 0 : i32
    return %c0_i32, %c0_i32_0 : i32, i32
  }
  func.func @transform_3(%arg0: i32, %arg1: i32) -> (i32, i32) {
    %c0_i32 = arith.constant 0 : i32
    %c0_i32_0 = arith.constant 0 : i32
    %c0_i32_1 = arith.constant 0 : i32
    return %c0_i32, %c0_i32_0 : i32, i32
  }
  func.func @transform_4(%arg0: i32, %arg1: i32) -> (i32, i32) {
    %c0_i32 = arith.constant 0 : i32
    %c0_i32_0 = arith.constant 0 : i32
    return %arg0, %c0_i32 : i32, i32
  }
}

</mosaic_0001>

<bundles_post_ra>
// kernel: graph_conv.1
= control target key start
LH: loop header
LB: loop body
LE: loop exit
PB: predicated region body
PF: predicated region fallthrough
CT: control target
= control target key end

     0   :  { %9 = vsyncpa [#allocation4], 0  ;;  %s1686_s0 = inlined_call_operand.hbm [shape: f32[384,384], index: 0, kind: input, shape index: {}]   ;;  %s1687_s1 = inlined_call_operand.vmem [shape: bf16[512,128], index: 1, kind: input, shape index: {}]   ;;  %s1688_s2 = inlined_call_operand.vmem [shape: bf16[128,128], index: 2, kind: input, shape index: {}]   ;;  %s1689_s3 = inlined_call_operand.vmem [shape: f32[1,128], index: 3, kind: input, shape index: {}]   ;;  %s1690_s4 = inlined_call_operand.vmem [shape: f32[384,128], index: 4, kind: output, shape index: {}]  }
   0x1   :  { %11 = vsyncpa [#allocation4 + $0x1], 0  ;;  %s1420_s15 = smov 0   ;;  %s1422_s16 = smov 0  }
   0x2   :  { %s1424_s17 = smov 0   ;;  %s1426_s18 = smov 0  }
   0x3   :  { %s1428_s19 = smov 0   ;;  %s1430_s20 = smov 0  }
   0x4   :  { %s1432_s21 = smov 0   ;;  %s1434_s22 = smov 0  }
   0x5 LB: > { %s26_s23 = sadd.s32 1, %s1381_s20  ;;  %s29_s24 = sadd.s32 1, %s1385_s21  ;;  %s1389_s22 = sphi %s1434_s22, %s17_s22   ;;  %s1385_s21 = sphi %s1432_s21, %s1708_s21   ;;  %s1381_s20 = sphi %s1430_s20, %s1707_s20   ;;  %s1377_s19 = sphi %s1428_s19, %s1706_s19   ;;  %s1373_s18 = sphi %s1426_s18, %s1705_s18   ;;  %s1369_s17 = sphi %s1424_s17, %s1704_s17   ;;  %s1365_s16 = sphi %s1422_s16, %s1703_s16   ;;  %s1361_s15 = sphi %s1420_s15, %s1702_s15  }
   0x6   : > { %p27_p0 = scmp.ge.s32.totalorder %s26_s23, 2  ;;  %s960_s25 = sadd.s32 4294967295, %s1389_s22  }
   0x7   : > { %p45_p1 = scmp.ne.s32.totalorder %s1369_s17, %s1365_s16  ;;  %p46_p2 = scmp.eq.s32.totalorder %s1389_s22, 0 }
   0x8   : > { %s1710_s23 = smov (%p27_p0, %s26_s23), 0  ;;  %s1712_s24 = smov (!%p27_p0, %s29_s24), %s1385_s21 }
   0x9   : > { %1693 = sst [smem:[#allocation6_spill]] %s1710_s23  ;;  %s34_s26 = ssub.s32 %s1381_s20, %s1710_s23 }
   0xa   : > { %p31_p3 = scmp.ge.s32.totalorder %s1712_s24, 3  ;;  %p51_p4 = scmp.ne.s32.totalorder %s1365_s16, %s1361_s15 }
   0xb   : > { %p47_p5 = por %p46_p2, %p45_p1  ;;  %p52_p6 = scmp.eq.s32.totalorder %s960_s25, 0 }
   0xc   : > { %s1714_s24 = smov (%p31_p3, %s1712_s24), 0  ;;  %s38_s30 = sadd.s32 1, %s1369_s17 }
   0xd   : > { %1694 = sst [smem:[#allocation7_spill]] %s1714_s24  ;;  %p1472_p7 = por %p52_p6, %p51_p4 }
   0xe   : > { %s33_s28 = ssub.s32 %s1385_s21, %s1714_s24  ;;  %p963_p9 = scmp.ge.s32.totalorder %s1389_s22, 6 }
   0xf   : > { %s35_s29 = sor.u32 %s34_s26, %s33_s28 }
  0x10   : > { %p36_p8 = scmp.eq.s32.totalorder %s35_s29, 0  ;;  %171 = sbr.rel (%p963_p9) target bundleno = 45 (0x2d), region = 24 }
  0x12   : > { %s1480_s5 = scalar_select %p36_p8, %s1369_s17, %s38_s30  }
  0x15   : > { %174 = sbr.rel (!%p47_p5) target bundleno = 45 (0x2d), region = 28  ;;  %s175_s6 = sand.u32 (%p47_p5), 1, %s1369_s17  }
  0x16   : > { %s966_s7 = sshll.u32 (%p47_p5), %s1381_s20, 1  ;;  %s964_s8 = sshll.u32 (%p47_p5), %s175_s6, 8 }
  0x17   : > { %s182_s9 = ssub.s32 (%p47_p5), 3, %s966_s7  ;;  %s1491_s12 = scalar_lea.sflag (%p47_p5), [#allocation4], %s175_s6 }
  0x18   : > { %p183_p10 = scmp.lt.s32.totalorder (%p47_p5), %s182_s9, 2  ;;  %s179_s13 = scalar_lea.vmem (%p47_p5), [#allocation3], %s964_s8 }
  0x1a   : > { %s1716_s9 = smov (!%p183_p10, %s182_s9), 2 }
  0x1b   : > { %s1488_s10 = sshll.u32 %s1716_s9, 11 }
  0x1c   : > { %s187_s11 = ssub.s32 4096, %s1488_s10 }
  0x1d   : > { %188 = vsyncadd %s1491_s12, %s187_s11  ;;  %p968_p11 = scmp.ne.s32.totalorder %s1488_s10, 0  ;;  %s1204_s14 = smul.u32 48, %s1385_s21 }
  0x1e   : > { %s971_s15 = sshll.u32 %s1716_s9, 3  ;;  %s196_s25 = sshll.u32 %s179_s13, 4  ;;  %s197_s25 = int_to_ptr.vmem [resolvable:$true] %s196_s25 }
  0x1f   : > { %s191_s26 = sadd.s32 %s1204_s14, %s966_s7  ;;  %s1309_s24 = scalar_lea.vmem %s197_s25, %s1488_s10 }
  0x20   : > { %s970_s28 = sshll.u32 %s191_s26, 7  ;;  %p1310_p12 = scmp.ne.s32.totalorder %s197_s25, %s1309_s24 }
  0x21   : > { %s193_s6 = scalar_lea.hbm %s1686_s0, %s970_s28  ;;  %s1391_s8 = smov [#allocation3]  }
  0x22   : > { %p1311_p13 = pnand %p1310_p12, %p968_p11  ;;  %s1313_s11 = sshll.u32 %s1391_s8, 4  ;;  %s1314_s11 = int_to_ptr.vmem [resolvable:$false] %s1313_s11 }
  0x23   : > { %s1315_s23 = scalar_lea.vmem %s1314_s11, 8192  ;;  %p1316_p1 = scmp.lt.s32.totalorder %s197_s25, %s1314_s11 }
  0x24   : > { %p1312_p0 = pneg %p1311_p13  ;;  %p1317_p2 = scmp.lt.s32.totalorder %s1315_s23, %s1309_s24 }
  0x26   : > { %p1318_p3 = por %p1317_p2, %p1316_p1 }
  0x28   : > { %p1319_p4 = pnand %p1318_p3, %p1312_p0 }
  0x2a   : > { %1322 = shalt.err (!%p1319_p4)
}
  0x2b   : > { %s1392_s7 = smov 384   ;;  %s1393_s9 = smov 256  }
  0x2c   : > { %202 = dma.hbm_to_vmem [thread:$0]  (%p968_p11), %s193_s6, %s1488_s10, %s197_s25, %s1491_s12, %s1392_s7, %s1393_s9, %s971_s15  }
  0x2d PF: > { %p974_p5 = scmp.ge.s32.totalorder %s1389_s22, 1  ;;  %p213_p6 = scmp.lt.s32.totalorder %s1389_s22, 7 }
  0x2f   : > { %p214_p8 = pnand %p974_p5, %p213_p6 }
  0x30   : > { %s219_s23 = sand.u32 (!%p214_p8), 1, %s1365_s16  }
  0x31   : > { %217 = sbr.rel (%p214_p8) target bundleno = 579 (0x243), region = 36  ;;  %s975_s24 = sshll.u32 (!%p214_p8), %s219_s23, 8 }
  0x32   : > { %s220_s13 = scalar_lea.sflag (!%p214_p8), [#allocation4], %s219_s23  ;;  %s1510_s14 = scalar_lea.vmem (!%p214_p8), [#allocation3], %s975_s24 }
  0x36   : > { %1356 = dma.done.wait (%p1472_p7), %s220_s13, 4096  }
  0x37   : > { %1358 = vsyncadd (%p1472_p7), %s220_s13, 4294963200  ;;  %s976_s10 = sshll.u32 %s1373_s18, 5  ;;  %s978_s12 = sshll.u32 %s1377_s19, 4 }
  0x38   : > { %p260_p9 = scmp.lt.s32.totalorder %s976_s10, 63  ;;  %p266_p10 = scmp.lt.s32.totalorder %s978_s12, 47 }
  0x39   : > { %p980_p7 = scmp.ne.s32.totalorder %s1373_s18, 0 }
  0x3a   : > { %s1718_s10 = smov (!%p260_p9, %s976_s10), 63  ;;  %s1720_s12 = smov (!%p266_p10, %s978_s12), 47 }
  0x3b   : > { %s977_s15 = sshll.u32 %s1718_s10, 2  ;;  %s979_s29 = sshll.u32 %s1720_s12, 3 }
  0x3c   : > { %s1521_s28 = scalar_lea.vmem %s1687_s1, %s977_s15  ;;  %s1526_s27 = scalar_lea.vmem %s1690_s4, %s979_s29 }
  0x3d   : > { %275 = sbr.rel (%p980_p7) target bundleno = 75 (0x4b), region = 44 }
  0x42   : > { %v1394_v0 = vmov 0.0  }
  0x43   : > { %276 = vst [vmem:[#allocation2 + $0x30] sm:$0xff] %v1394_v0  ;;  %277 = vst [vmem:[#allocation2] sm:$0xff] %v1394_v0 }
  0x44   : > { %278 = vst [vmem:[#allocation2 + $0x58] sm:$0xff] %v1394_v0  ;;  %279 = vst [vmem:[#allocation2 + $0x18] sm:$0xff] %v1394_v0 }
  0x45   : > { %280 = vst [vmem:[#allocation2 + $0x50] sm:$0xff] %v1394_v0  ;;  %281 = vst [vmem:[#allocation2 + $0x68] sm:$0xff] %v1394_v0 }
  0x46   : > { %282 = vst [vmem:[#allocation2 + $0x8] sm:$0xff] %v1394_v0  ;;  %283 = vst [vmem:[#allocation2 + $0x48] sm:$0xff] %v1394_v0 }
  0x47   : > { %284 = vst [vmem:[#allocation2 + $0x40] sm:$0xff] %v1394_v0  ;;  %285 = vst [vmem:[#allocation2 + $0x20] sm:$0xff] %v1394_v0 }
  0x48   : > { %286 = vst [vmem:[#allocation2 + $0x10] sm:$0xff] %v1394_v0  ;;  %287 = vst [vmem:[#allocation2 + $0x38] sm:$0xff] %v1394_v0 }
  0x49   : > { %288 = vst [vmem:[#allocation2 + $0x60] sm:$0xff] %v1394_v0  ;;  %289 = vst [vmem:[#allocation2 + $0x70] sm:$0xff] %v1394_v0 }
  0x4a   : > { %290 = vst [vmem:[#allocation2 + $0x78] sm:$0xff] %v1394_v0  ;;  %291 = vst [vmem:[#allocation2 + $0x28] sm:$0xff] %v1394_v0 }
  0x4b PF: > { %v1273_v1 = vld [vmem:[%s1521_s28 + $0x78] sm:$0xff]   ;;  %v324_v2 = vlaneseq  ;;  %v1275_v4 = vld [vmem:[%s1521_s28 + $0x70] sm:$0xff]   ;;  %v1277_v7 = vld [vmem:[%s1521_s28 + $0x68] sm:$0xff]   ;;  %s981_s19 = sshll.u32 %s1373_s18, 8  ;;  %p1046_p11 = scmp.ne.s32.totalorder %s1373_s18, 1 }
  0x4c   : > { %v1274_v3 = vld [vmem:[%s1521_s28 + $0x38] sm:$0xff]   ;;  %1060 = vmatprep.subr.bf16.mxu0 %v1273_v1  ;;  %1172 = vmatprep.subr.bf16.mxu1 %v1273_v1  ;;  %v1276_v5 = vld [vmem:[%s1521_s28 + $0x30] sm:$0xff]   ;;  %v1278_v8 = vld [vmem:[%s1521_s28 + $0x28] sm:$0xff]   ;;  %v328_v11 = vstv %s981_s19 }
  0x4d   : > { %1061 = vmatpush3.bf16.msra.mxu0 %v1274_v3  ;;  %1180 = vmatpush3.bf16.msra.mxu1 %v1274_v3  ;;  %v325_v6 = vand.u32 127, %v324_v2  ;;  %v1279_v10 = vld [vmem:[%s1521_s28 + $0x60] sm:$0xff]   ;;  %v1281_v14 = vld [vmem:[%s1521_s28 + $0x58] sm:$0xff]   ;;  %v1283_v16 = vld [vmem:[%s1521_s28 + $0x50] sm:$0xff]  }
  0x4e   : > { %1062 = vmatprep.subr.bf16.mxu0 %v1275_v4  ;;  %1173 = vmatprep.subr.bf16.mxu1 %v1275_v4  ;;  %v1280_v12 = vld [vmem:[%s1521_s28 + $0x20] sm:$0xff]   ;;  %v1282_v15 = vld [vmem:[%s1521_s28 + $0x18] sm:$0xff]   ;;  %v293_v17 = vld [vmem:[%s1510_s14 + $0x8] sm:$0xff] }
  0x4f   : > { %v326_v9 = vadd.s32 128, %v325_v6  ;;  %v295_v18 = vld [vmem:[%s1510_s14 + $0x18] sm:$0xff]  ;;  %v309_v20 = vld [vmem:[%s1510_s14 + $0x88] sm:$0xff]  ;;  %v1284_v24 = vld [vmem:[%s1521_s28 + $0x10] sm:$0xff]   ;;  %v329_v28 = vadd.s32 %v328_v11, %v325_v6 }
  0x50   : > { %v999_v19 = vpack.c.bf16 %v295_v18, %v293_v17  ;;  %v311_v21 = vld [vmem:[%s1510_s14 + $0x98] sm:$0xff]  ;;  %v1285_v25 = vld [vmem:[%s1521_s28 + $0x48] sm:$0xff]   ;;  %v1287_v27 = vld [vmem:[%s1521_s28 + $0x40] sm:$0xff]  }
  0x51   : > { %1063 = vmatpush3.bf16.msra.mxu0 %v1276_v5  ;;  %1181 = vmatpush3.bf16.msra.mxu1 %v1276_v5  ;;  %v330_v13 = vadd.s32 %v328_v11, %v326_v9  ;;  %v1023_v23 = vpack.c.bf16 %v311_v21, %v309_v20  ;;  %v1286_v26 = vld [vmem:[%s1521_s28 + $0x8] sm:$0xff]   ;;  %v1288_v29 = vld [vmem:[%s1521_s28] sm:$0xff]   ;;  %v294_v31 = vld [vmem:[%s1510_s14 + $0x10] sm:$0xff]  ;;  %vm331_vm2 = vcmp.lt.s32.totalorder %v329_v28, 384 }
  0x52   : > { %1064 = vmatprep.subr.bf16.mxu0 %v1277_v7  ;;  %1174 = vmatprep.subr.bf16.mxu1 %v1277_v7  ;;  %v292_v30 = vld [vmem:[%s1510_s14] sm:$0xff]  ;;  %v310_v33 = vld [vmem:[%s1510_s14 + $0x90] sm:$0xff]  ;;  %v297_v34 = vld [vmem:[%s1510_s14 + $0x28] sm:$0xff] }
  0x53   : > { %vm332_vm0 = vcmp.lt.s32.totalorder %v330_v13, 384  ;;  %v308_v32 = vld [vmem:[%s1510_s14 + $0x80] sm:$0xff]  ;;  %v299_v35 = vld [vmem:[%s1510_s14 + $0x38] sm:$0xff]  ;;  %v313_v36 = vld [vmem:[%s1510_s14 + $0xa8] sm:$0xff]  ;;  %v1002_v38 = vpack.c.bf16 %v294_v31, %v292_v30 }
  0x54   : > { %vm1545_vm1 = vmpackc.low %vm332_vm0, %vm332_vm0  ;;  %v315_v37 = vld [vmem:[%s1510_s14 + $0xb8] sm:$0xff]  ;;  %v1026_v39 = vpack.c.bf16 %v310_v33, %v308_v32  ;;  %v1005_v41 = vpack.c.bf16 %v299_v35, %v297_v34  ;;  %v296_v43 = vld [vmem:[%s1510_s14 + $0x20] sm:$0xff] }
  0x55   : > { %1065 = vmatpush3.bf16.msra.mxu0 %v1278_v8  ;;  %1182 = vmatpush3.bf16.msra.mxu1 %v1278_v8  ;;  %vm1566_vm3 = vmpackc.low %vm331_vm2, %vm331_vm2  ;;  %v1029_v42 = vpack.c.bf16 %v315_v37, %v313_v36  ;;  %v298_v44 = vld [vmem:[%s1510_s14 + $0x30] sm:$0xff]  ;;  %v312_v45 = vld [vmem:[%s1510_s14 + $0xa0] sm:$0xff] }
  0x56   : > { %1066 = vmatprep.subr.bf16.mxu0 %v1279_v10  ;;  %1175 = vmatprep.subr.bf16.mxu1 %v1279_v10  ;;  %v314_v46 = vld [vmem:[%s1510_s14 + $0xb0] sm:$0xff]  ;;  %v301_v47 = vld [vmem:[%s1510_s14 + $0x48] sm:$0xff]  ;;  %v303_v48 = vld [vmem:[%s1510_s14 + $0x58] sm:$0xff]  ;;  %v1008_v51 = vpack.c.bf16 %v298_v44, %v296_v43 }
  0x57   : > { %1000 = vmatprep.mubr.msk.bf16.mxu0 %vm1545_vm1, %v999_v19  ;;  %1024 = vmatprep.mubr.msk.bf16.mxu1 %vm1545_vm1, %v1023_v23  ;;  %v317_v49 = vld [vmem:[%s1510_s14 + $0xc8] sm:$0xff]  ;;  %v319_v50 = vld [vmem:[%s1510_s14 + $0xd8] sm:$0xff]  ;;  %v1032_v52 = vpack.c.bf16 %v314_v46, %v312_v45  ;;  %v1011_v53 = vpack.c.bf16 %v303_v48, %v301_v47  ;;  %v300_v55 = vld [vmem:[%s1510_s14 + $0x40] sm:$0xff] }
  0x58   : > { %v1035_v54 = vpack.c.bf16 %v319_v50, %v317_v49  ;;  %v302_v56 = vld [vmem:[%s1510_s14 + $0x50] sm:$0xff]  ;;  %v316_v57 = vld [vmem:[%s1510_s14 + $0xc0] sm:$0xff]  ;;  %v305_v59 = vld [vmem:[%s1510_s14 + $0x68] sm:$0xff] }
  0x59   : > { %1067 = vmatpush3.bf16.msra.mxu0 %v1280_v12  ;;  %1183 = vmatpush3.bf16.msra.mxu1 %v1280_v12  ;;  %v318_v58 = vld [vmem:[%s1510_s14 + $0xd0] sm:$0xff]  ;;  %v307_v60 = vld [vmem:[%s1510_s14 + $0x78] sm:$0xff]  ;;  %v321_v61 = vld [vmem:[%s1510_s14 + $0xe8] sm:$0xff]  ;;  %v1014_v63 = vpack.c.bf16 %v302_v56, %v300_v55 }
  0x5a   : > { %1068 = vmatprep.subr.bf16.mxu0 %v1281_v14  ;;  %1176 = vmatprep.subr.bf16.mxu1 %v1281_v14  ;;  %v323_v62 = vld [vmem:[%s1510_s14 + $0xf8] sm:$0xff]  ;;  %v1038_v0 = vpack.c.bf16 %v318_v58, %v316_v57  ;;  %v1017_v1 = vpack.c.bf16 %v307_v60, %v305_v59  ;;  %v304_v3 = vld [vmem:[%s1510_s14 + $0x60] sm:$0xff]  ;;  %v306_v4 = vld [vmem:[%s1510_s14 + $0x70] sm:$0xff] }
  0x5b   : > { %v1041_v2 = vpack.c.bf16 %v323_v62, %v321_v61  ;;  %v320_v5 = vld [vmem:[%s1510_s14 + $0xe0] sm:$0xff]  ;;  %v322_v6 = vld [vmem:[%s1510_s14 + $0xf0] sm:$0xff]  ;;  %v1020_v7 = vpack.c.bf16 %v306_v4, %v304_v3  ;;  %v383_v31 = vld [vmem:[#allocation2 + $0x58] sm:$0xff] }
  0x5c   : > { %v1044_v8 = vpack.c.bf16 %v322_v6, %v320_v5  ;;  %v381_v11 = vld [vmem:[#allocation2 + $0x30] sm:$0xff]  ;;  %v389_v13 = vld [vmem:[#allocation2 + $0x40] sm:$0xff]  ;;  %v392_v43 = vld [vmem:[#allocation2 + $0x38] sm:$0xff] }
  0x5d   : > { %1069 = vmatpush3.bf16.msra.mxu0 %v1282_v15  ;;  %1184 = vmatpush3.bf16.msra.mxu1 %v1282_v15  ;;  %v382_v21 = vld [vmem:[#allocation2] sm:$0xff]  ;;  %v391_v33 = vld [vmem:[#allocation2 + $0x10] sm:$0xff]  ;;  %v386_v61 = vld [vmem:[#allocation2 + $0x68] sm:$0xff] }
  0x5e   : > { %1070 = vmatprep.subr.bf16.mxu0 %v1283_v16  ;;  %1177 = vmatprep.subr.bf16.mxu1 %v1283_v16  ;;  %v390_v23 = vld [vmem:[#allocation2 + $0x20] sm:$0xff] }
  0x61   : > { %1071 = vmatpush3.bf16.msra.mxu0 %v1284_v24  ;;  %1185 = vmatpush3.bf16.msra.mxu1 %v1284_v24 }
  0x62   : > { %1072 = vmatprep.subr.bf16.mxu0 %v1285_v25  ;;  %1178 = vmatprep.subr.bf16.mxu1 %v1285_v25 }
  0x65   : > { %1073 = vmatpush3.bf16.msra.mxu0 %v1286_v26  ;;  %1186 = vmatpush3.bf16.msra.mxu1 %v1286_v26 }
  0x66   : > { %1074 = vmatprep.subr.bf16.mxu0 %v1287_v27  ;;  %1179 = vmatprep.subr.bf16.mxu1 %v1287_v27 }
  0x69   : > { %1075 = vmatpush3.bf16.msra.mxu0 %v1288_v29  ;;  %1187 = vmatpush3.bf16.msra.mxu1 %v1288_v29 }
  0x6c   : > { %1003 = vmatmul.mubr.msk.bf16.vlgmr.msra.gmra.mxu0 %vm1566_vm3, %v1002_v38  ;;  %1027 = vmatmul.mubr.msk.bf16.vlgmr.msra.gmra.mxu1 %vm1566_vm3, %v1026_v39 }
  0x6d   : > { %1006 = vmatprep.mubr.msk.bf16.mxu0 %vm1545_vm1, %v1005_v41  ;;  %1030 = vmatprep.mubr.msk.bf16.mxu1 %vm1545_vm1, %v1029_v42  ;;  %v384_v41 = vld [vmem:[#allocation2 + $0x18] sm:$0xff] }
  0x74   : > { %1009 = vmatmul.mubr.msk.bf16.gmra.mxu0 %vm1566_vm3, %v1008_v51  ;;  %1033 = vmatmul.mubr.msk.bf16.gmra.mxu1 %vm1566_vm3, %v1032_v52  ;;  %v385_v51 = vld [vmem:[#allocation2 + $0x50] sm:$0xff] }
  0x75   : > { %1012 = vmatprep.mubr.msk.bf16.mxu0 %vm1545_vm1, %v1011_v53  ;;  %1036 = vmatprep.mubr.msk.bf16.mxu1 %vm1545_vm1, %v1035_v54  ;;  %v393_v53 = vld [vmem:[#allocation2 + $0x60] sm:$0xff] }
  0x7c   : > { %1015 = vmatmul.mubr.msk.bf16.gmra.mxu0 %vm1566_vm3, %v1014_v63  ;;  %1039 = vmatmul.mubr.msk.bf16.gmra.mxu1 %vm1566_vm3, %v1038_v0  ;;  %v394_v63 = vld [vmem:[#allocation2 + $0x70] sm:$0xff] }
  0x7d   : > { %1018 = vmatprep.mubr.msk.bf16.mxu0 %vm1545_vm1, %v1017_v1  ;;  %1042 = vmatprep.mubr.msk.bf16.mxu1 %vm1545_vm1, %v1041_v2 }
  0x84   : > { %1021 = vmatmul.mubr.msk.bf16.gmra.mxu0 %vm1566_vm3, %v1020_v7  ;;  %1045 = vmatmul.mubr.msk.bf16.gmra.mxu1 %vm1566_vm3, %v1044_v8  ;;  %v387_v7 = vld [vmem:[#allocation2 + $0x8] sm:$0xff] }
 0x12c   : > { %v1076_v9 = vpop.f32.mrf.mxu0  ;;  %v1100_v10 = vpop.f32.mrf.mxu1 }
 0x12e   : > { %v1077_v12 = vpop.f32.mrf.mxu0  ;;  %v1101_v14 = vpop.f32.mrf.mxu1 }
 0x12f   : > { %v1078_v15 = vadd.f32 %v1077_v12, %v1076_v9  ;;  %v1102_v16 = vadd.f32 %v1101_v14, %v1100_v10  ;;  %v395_v9 = vld [vmem:[#allocation2 + $0x78] sm:$0xff] }
 0x130   : > { %v1079_v17 = vpop.f32.mrf.mxu0  ;;  %v1103_v18 = vpop.f32.mrf.mxu1 }
 0x131   : > { %v622_v19 = vadd.f32 %v1078_v15, %v381_v11  ;;  %v630_v20 = vadd.f32 %v1102_v16, %v389_v13 }
 0x132   : > { %v1080_v22 = vpop.f32.mrf.mxu0  ;;  %v1104_v24 = vpop.f32.mrf.mxu1 }
 0x133   : > { %638 = vst [vmem:[#allocation2 + $0x30] sm:$0xff] %v622_v19  ;;  %646 = vst [vmem:[#allocation2 + $0x40] sm:$0xff] %v630_v20  ;;  %v1081_v25 = vadd.f32 %v1080_v22, %v1079_v17  ;;  %v1105_v26 = vadd.f32 %v1104_v24, %v1103_v18  ;;  %v388_v17 = vld [vmem:[#allocation2 + $0x48] sm:$0xff] }
 0x134   : > { %v1082_v27 = vpop.f32.mrf.mxu0  ;;  %v1106_v28 = vpop.f32.mrf.mxu1  ;;  %v396_v19 = vld [vmem:[#allocation2 + $0x28] sm:$0xff] }
 0x135   : > { %v623_v29 = vadd.f32 %v1081_v25, %v382_v21  ;;  %v631_v30 = vadd.f32 %v1105_v26, %v390_v23 }
 0x136   : > { %v1083_v32 = vpop.f32.mrf.mxu0  ;;  %v1107_v34 = vpop.f32.mrf.mxu1 }
 0x137   : > { %639 = vst [vmem:[#allocation2] sm:$0xff] %v623_v29  ;;  %647 = vst [vmem:[#allocation2 + $0x20] sm:$0xff] %v631_v30  ;;  %v1084_v35 = vadd.f32 %v1083_v32, %v1082_v27  ;;  %v1108_v36 = vadd.f32 %v1107_v34, %v1106_v28 }
 0x138   : > { %v1085_v37 = vpop.f32.mrf.mxu0  ;;  %v1109_v38 = vpop.f32.mrf.mxu1 }
 0x139   : > { %v624_v39 = vadd.f32 %v1084_v35, %v383_v31  ;;  %v632_v40 = vadd.f32 %v1108_v36, %v391_v33 }
 0x13a   : > { %v1086_v42 = vpop.f32.mrf.mxu0  ;;  %v1110_v44 = vpop.f32.mrf.mxu1 }
 0x13b   : > { %640 = vst [vmem:[#allocation2 + $0x58] sm:$0xff] %v624_v39  ;;  %648 = vst [vmem:[#allocation2 + $0x10] sm:$0xff] %v632_v40  ;;  %v1087_v45 = vadd.f32 %v1086_v42, %v1085_v37  ;;  %v1111_v46 = vadd.f32 %v1110_v44, %v1109_v38 }
 0x13c   : > { %v1088_v47 = vpop.f32.mrf.mxu0  ;;  %v1112_v48 = vpop.f32.mrf.mxu1 }
 0x13d   : > { %v625_v49 = vadd.f32 %v1087_v45, %v384_v41  ;;  %v633_v50 = vadd.f32 %v1111_v46, %v392_v43 }
 0x13e   : > { %v1089_v52 = vpop.f32.mrf.mxu0  ;;  %v1113_v54 = vpop.f32.mrf.mxu1 }
 0x13f   : > { %641 = vst [vmem:[#allocation2 + $0x18] sm:$0xff] %v625_v49  ;;  %649 = vst [vmem:[#allocation2 + $0x38] sm:$0xff] %v633_v50  ;;  %v1090_v55 = vadd.f32 %v1089_v52, %v1088_v47  ;;  %v1114_v56 = vadd.f32 %v1113_v54, %v1112_v48 }
 0x140   : > { %v1091_v57 = vpop.f32.mrf.mxu0  ;;  %v1115_v58 = vpop.f32.mrf.mxu1 }
 0x141   : > { %v626_v59 = vadd.f32 %v1090_v55, %v385_v51  ;;  %v634_v60 = vadd.f32 %v1114_v56, %v393_v53 }
 0x142   : > { %v1092_v62 = vpop.f32.mrf.mxu0  ;;  %v1116_v0 = vpop.f32.mrf.mxu1 }
 0x143   : > { %642 = vst [vmem:[#allocation2 + $0x50] sm:$0xff] %v626_v59  ;;  %650 = vst [vmem:[#allocation2 + $0x60] sm:$0xff] %v634_v60  ;;  %v1093_v1 = vadd.f32 %v1092_v62, %v1091_v57  ;;  %v1117_v2 = vadd.f32 %v1116_v0, %v1115_v58 }
 0x144   : > { %v1094_v3 = vpop.f32.mrf.mxu0  ;;  %v1118_v4 = vpop.f32.mrf.mxu1 }
 0x145   : > { %v627_v5 = vadd.f32 %v1093_v1, %v386_v61  ;;  %v635_v6 = vadd.f32 %v1117_v2, %v394_v63 }
 0x146   : > { %v1095_v8 = vpop.f32.mrf.mxu0  ;;  %v1119_v10 = vpop.f32.mrf.mxu1 }
 0x147   : > { %643 = vst [vmem:[#allocation2 + $0x68] sm:$0xff] %v627_v5  ;;  %651 = vst [vmem:[#allocation2 + $0x70] sm:$0xff] %v635_v6  ;;  %v1096_v11 = vadd.f32 %v1095_v8, %v1094_v3  ;;  %v1120_v12 = vadd.f32 %v1119_v10, %v1118_v4 }
 0x148   : > { %v1097_v13 = vpop.f32.mrf.mxu0  ;;  %v1121_v14 = vpop.f32.mrf.mxu1 }
 0x149   : > { %v628_v15 = vadd.f32 %v1096_v11, %v387_v7  ;;  %v636_v16 = vadd.f32 %v1120_v12, %v395_v9 }
 0x14a   : > { %v1098_v18 = vpop.f32.mrf.mxu0  ;;  %v1122_v20 = vpop.f32.mrf.mxu1 }
 0x14b   : > { %644 = vst [vmem:[#allocation2 + $0x8] sm:$0xff] %v628_v15  ;;  %652 = vst [vmem:[#allocation2 + $0x78] sm:$0xff] %v636_v16  ;;  %v1099_v21 = vadd.f32 %v1098_v18, %v1097_v13  ;;  %v1123_v22 = vadd.f32 %v1122_v20, %v1121_v14  ;;  %657 = sbr.rel (%p1046_p11) target bundleno = 579 (0x243), region = 48 }
 0x14d   : > { %v629_v23 = vadd.f32 %v1099_v21, %v388_v17  ;;  %v637_v24 = vadd.f32 %v1123_v22, %v396_v19 }
 0x14f   : > { %645 = vst [vmem:[#allocation2 + $0x48] sm:$0xff] %v629_v23  ;;  %653 = vst [vmem:[#allocation2 + $0x28] sm:$0xff] %v637_v24 }
 0x150   : > { %v1289_v25 = vld [vmem:[%s1688_s2 + $0x38] sm:$0xff]   ;;  %v1290_v26 = vld [vmem:[%s1688_s2 + $0x30] sm:$0xff]   ;;  %v1291_v27 = vld [vmem:[%s1688_s2 + $0x28] sm:$0xff]  }
 0x151   : > { %1140 = vmatprep.subr.bf16.mxu0 %v1289_v25  ;;  %1188 = vmatprep.subr.bf16.mxu1 %v1289_v25  ;;  %v1292_v28 = vld [vmem:[%s1688_s2 + $0x20] sm:$0xff]   ;;  %v658_v29 = vld [vmem:[#allocation2 + $0x30] sm:$0xff]  ;;  %v1293_v35 = vld [vmem:[%s1688_s2 + $0x18] sm:$0xff]  }
 0x152   : > { %1141 = vmatpush3.bf16.msra.mxu0 %v1289_v25  ;;  %1196 = vmatpush3.bf16.msra.mxu1 %v1289_v25  ;;  %v659_v30 = vld [vmem:[#allocation2] sm:$0xff]  ;;  %v1294_v36 = vld [vmem:[%s1688_s2 + $0x10] sm:$0xff]   ;;  %v1295_v37 = vld [vmem:[%s1688_s2 + $0x8] sm:$0xff]  }
 0x153   : > { %1142 = vmatprep.subr.bf16.mxu0 %v1290_v26  ;;  %1189 = vmatprep.subr.bf16.mxu1 %v1290_v26  ;;  %v666_v31 = vld [vmem:[#allocation2 + $0x40] sm:$0xff]  ;;  %v674_v32 = vpack.c.bf16 %v659_v30, %v658_v29  ;;  %v660_v39 = vld [vmem:[#allocation2 + $0x58] sm:$0xff]  ;;  %v668_v41 = vld [vmem:[#allocation2 + $0x10] sm:$0xff] }
 0x154   : > { %v667_v33 = vld [vmem:[#allocation2 + $0x20] sm:$0xff]  ;;  %v661_v40 = vld [vmem:[#allocation2 + $0x18] sm:$0xff]  ;;  %v662_v43 = vld [vmem:[#allocation2 + $0x50] sm:$0xff] }
 0x155   : > { %v678_v34 = vpack.c.bf16 %v667_v33, %v666_v31  ;;  %1156 = vmatprep.mubr.bf16.mxu0 %v674_v32  ;;  %v1296_v38 = vld [vmem:[%s1688_s2] sm:$0xff]   ;;  %v669_v42 = vld [vmem:[#allocation2 + $0x38] sm:$0xff]  ;;  %v663_v44 = vld [vmem:[#allocation2 + $0x68] sm:$0xff]  ;;  %v675_v47 = vpack.c.bf16 %v661_v40, %v660_v39 }
 0x156   : > { %1143 = vmatpush3.bf16.msra.mxu0 %v1290_v26  ;;  %1197 = vmatpush3.bf16.msra.mxu1 %v1290_v26  ;;  %v670_v45 = vld [vmem:[#allocation2 + $0x60] sm:$0xff]  ;;  %v671_v46 = vld [vmem:[#allocation2 + $0x70] sm:$0xff]  ;;  %v679_v48 = vpack.c.bf16 %v669_v42, %v668_v41  ;;  %v676_v49 = vpack.c.bf16 %v663_v44, %v662_v43  ;;  %v664_v51 = vld [vmem:[#allocation2 + $0x8] sm:$0xff] }
 0x157   : > { %1144 = vmatprep.subr.bf16.mxu0 %v1291_v27  ;;  %1190 = vmatprep.subr.bf16.mxu1 %v1291_v27  ;;  %v680_v50 = vpack.c.bf16 %v671_v46, %v670_v45  ;;  %v665_v52 = vld [vmem:[#allocation2 + $0x48] sm:$0xff]  ;;  %v672_v53 = vld [vmem:[#allocation2 + $0x78] sm:$0xff]  ;;  %v1047_v57 = vld [vmem:[%s1689_s3] ss:$0 sm:$0xff] }
 0x158   : > { %1164 = vmatprep.mubr.bf16.mxu1 %v678_v34  ;;  %v673_v54 = vld [vmem:[#allocation2 + $0x28] sm:$0xff]  ;;  %v677_v55 = vpack.c.bf16 %v665_v52, %v664_v51 }
 0x159   : > { %v681_v56 = vpack.c.bf16 %v673_v54, %v672_v53 }
 0x15a   : > { %1145 = vmatpush3.bf16.msra.mxu0 %v1291_v27  ;;  %1198 = vmatpush3.bf16.msra.mxu1 %v1291_v27 }
 0x15b   : > { %1146 = vmatprep.subr.bf16.mxu0 %v1292_v28  ;;  %1191 = vmatprep.subr.bf16.mxu1 %v1292_v28 }
 0x15e   : > { %1147 = vmatpush3.bf16.msra.mxu0 %v1292_v28  ;;  %1199 = vmatpush3.bf16.msra.mxu1 %v1292_v28 }
 0x15f   : > { %1148 = vmatprep.subr.bf16.mxu0 %v1293_v35  ;;  %1192 = vmatprep.subr.bf16.mxu1 %v1293_v35 }
 0x162   : > { %1149 = vmatpush3.bf16.msra.mxu0 %v1293_v35  ;;  %1200 = vmatpush3.bf16.msra.mxu1 %v1293_v35 }
 0x163   : > { %1150 = vmatprep.subr.bf16.mxu0 %v1294_v36  ;;  %1193 = vmatprep.subr.bf16.mxu1 %v1294_v36 }
 0x166   : > { %1151 = vmatpush3.bf16.msra.mxu0 %v1294_v36  ;;  %1201 = vmatpush3.bf16.msra.mxu1 %v1294_v36 }
 0x167   : > { %1152 = vmatprep.subr.bf16.mxu0 %v1295_v37  ;;  %1194 = vmatprep.subr.bf16.mxu1 %v1295_v37 }
 0x16a   : > { %1153 = vmatpush3.bf16.msra.mxu0 %v1295_v37  ;;  %1202 = vmatpush3.bf16.msra.mxu1 %v1295_v37 }
 0x16b   : > { %1154 = vmatprep.subr.bf16.mxu0 %v1296_v38  ;;  %1195 = vmatprep.subr.bf16.mxu1 %v1296_v38 }
 0x16e   : > { %1155 = vmatpush3.bf16.msra.mxu0 %v1296_v38  ;;  %1203 = vmatpush3.bf16.msra.mxu1 %v1296_v38 }
 0x171   : > { %1157 = vmatmul.mubr.bf16.vlgmr.msra.gmra.mxu0 %v675_v47  ;;  %1165 = vmatmul.mubr.bf16.vlgmr.msra.gmra.mxu1 %v679_v48 }
 0x172   : > { %1160 = vmatprep.mubr.bf16.mxu0 %v676_v49  ;;  %1168 = vmatprep.mubr.bf16.mxu1 %v680_v50 }
 0x179   : > { %1161 = vmatmul.mubr.bf16.gmra.mxu0 %v677_v55  ;;  %1169 = vmatmul.mubr.bf16.gmra.mxu1 %v681_v56 }
 0x231   : > { %v1158_v58 = vpop.f32.mrf.mxu0  ;;  %v1166_v59 = vpop.f32.mrf.mxu1 }
 0x232   : > { %v796_v60 = vadd.f32 %v1158_v58, %v1047_v57  ;;  %v828_v61 = vadd.f32 %v1166_v59, %v1047_v57 }
 0x233   : > { %v787_v62 = vpop.f32.mrf.mxu0  ;;  %v819_v63 = vpop.f32.mrf.mxu1 }
 0x234   : > { %852 = vst [vmem:[%s1526_s27 + $0x10] sm:$0xff] %v796_v60  ;;  %860 = vst [vmem:[%s1526_s27 + $0x50] sm:$0xff] %v828_v61  ;;  %v788_v0 = vadd.f32 %v1047_v57, %v787_v62  ;;  %v820_v1 = vadd.f32 %v1047_v57, %v819_v63 }
 0x235   : > { %v1159_v2 = vpop.f32.mrf.mxu0  ;;  %v1167_v3 = vpop.f32.mrf.mxu1 }
 0x236   : > { %850 = vst [vmem:[%s1526_s27] sm:$0xff] %v788_v0  ;;  %858 = vst [vmem:[%s1526_s27 + $0x40] sm:$0xff] %v820_v1  ;;  %v799_v4 = vadd.f32 %v1159_v2, %v1047_v57  ;;  %v831_v5 = vadd.f32 %v1167_v3, %v1047_v57 }
 0x237   : > { %v790_v6 = vpop.f32.mrf.mxu0  ;;  %v822_v7 = vpop.f32.mrf.mxu1 }
 0x238   : > { %853 = vst [vmem:[%s1526_s27 + $0x18] sm:$0xff] %v799_v4  ;;  %861 = vst [vmem:[%s1526_s27 + $0x58] sm:$0xff] %v831_v5  ;;  %v791_v8 = vadd.f32 %v1047_v57, %v790_v6  ;;  %v823_v9 = vadd.f32 %v1047_v57, %v822_v7 }
 0x239   : > { %v1162_v10 = vpop.f32.mrf.mxu0  ;;  %v1170_v11 = vpop.f32.mrf.mxu1 }
 0x23a   : > { %851 = vst [vmem:[%s1526_s27 + $0x8] sm:$0xff] %v791_v8  ;;  %859 = vst [vmem:[%s1526_s27 + $0x48] sm:$0xff] %v823_v9  ;;  %v812_v12 = vadd.f32 %v1162_v10, %v1047_v57  ;;  %v844_v13 = vadd.f32 %v1170_v11, %v1047_v57 }
 0x23b   : > { %v803_v14 = vpop.f32.mrf.mxu0  ;;  %v835_v15 = vpop.f32.mrf.mxu1 }
 0x23c   : > { %856 = vst [vmem:[%s1526_s27 + $0x30] sm:$0xff] %v812_v12  ;;  %864 = vst [vmem:[%s1526_s27 + $0x70] sm:$0xff] %v844_v13  ;;  %v804_v16 = vadd.f32 %v1047_v57, %v803_v14  ;;  %v836_v17 = vadd.f32 %v1047_v57, %v835_v15 }
 0x23d   : > { %v1163_v18 = vpop.f32.mrf.mxu0  ;;  %v1171_v19 = vpop.f32.mrf.mxu1 }
 0x23e   : > { %854 = vst [vmem:[%s1526_s27 + $0x20] sm:$0xff] %v804_v16  ;;  %862 = vst [vmem:[%s1526_s27 + $0x60] sm:$0xff] %v836_v17  ;;  %v815_v20 = vadd.f32 %v1163_v18, %v1047_v57  ;;  %v847_v21 = vadd.f32 %v1171_v19, %v1047_v57 }
 0x23f   : > { %v806_v22 = vpop.f32.mrf.mxu0  ;;  %v838_v23 = vpop.f32.mrf.mxu1 }
 0x240   : > { %857 = vst [vmem:[%s1526_s27 + $0x38] sm:$0xff] %v815_v20  ;;  %865 = vst [vmem:[%s1526_s27 + $0x78] sm:$0xff] %v847_v21  ;;  %v807_v24 = vadd.f32 %v1047_v57, %v806_v22  ;;  %v839_v25 = vadd.f32 %v1047_v57, %v838_v23 }
 0x242   : > { %855 = vst [vmem:[%s1526_s27 + $0x28] sm:$0xff] %v807_v24  ;;  %863 = vst [vmem:[%s1526_s27 + $0x68] sm:$0xff] %v839_v25 }
 0x243 PF: > { %s17_s22 = sadd.s32 1, %s1389_s22   ;;  %s1700_s8 = sld [smem:[#allocation6_spill]] }
 0x244   : > { %p14_p12 = scmp.ge.s32.totalorder %s17_s22, 8   ;;  %s1701_s11 = sld [smem:[#allocation7_spill]] }
 0x245   : > { %s1702_s15 = smov %s1365_s16  ;;  %s1703_s16 = smov %s1369_s17 }
 0x246   : > { %s1704_s17 = smov %s1480_s5  ;;  %s1705_s18 = smov %s1381_s20 }
 0x247   : > { %s1706_s19 = smov %s1385_s21  ;;  %16 = sbr.rel (!%p14_p12) target bundleno = 5 (0x5), region = 87 }
 0x249   : > { %s1707_s20 = smov %s1700_s8 }
 0x24a   : > { %s1708_s21 = smov %s1701_s11 }
 0x24c   :  { %888 = vsyncpa [#allocation4], 1 }
 0x24d   :  { %890 = vsyncpa [#allocation4 + $0x1], 1 }

</bundles_post_ra>
